<compile_context>
chip_gen: v6e
topology: v6e:2x2x1
jax: 0.10.0
libtpu: 0.0.40
codegen_flags: <defaults>
</compile_context>

<pallas_src>
import functools

import jax
import jax.numpy as jnp
from jax.experimental import pallas as pl
from jax.experimental.pallas import tpu as pltpu

_C1 = 0.01 ** 2
_C2 = 0.03 ** 2
_WINDOW_SIZE = 11
_SIGMA = 1.5


# ----------------------------- host-side helpers ----------------------------

def _gaussian_1d(window_size: int, sigma: float) -> jnp.ndarray:
  x = jnp.arange(window_size, dtype=jnp.float32)
  g = jnp.exp(-((x - window_size // 2) ** 2) / (2.0 * sigma ** 2))
  return g / jnp.sum(g)


def _blur_matrix(n: int, g: jnp.ndarray) -> jnp.ndarray:
  """Banded Toeplitz M with (M @ x) == zero-padded 'same' 1-D Gaussian blur."""
  ws = g.shape[0]
  r = ws // 2
  idx = jnp.arange(n)
  diff = idx[None, :] - idx[:, None]          # k - i
  gathered = g[jnp.clip(diff + r, 0, ws - 1)]
  return jnp.where(jnp.abs(diff) <= r, gathered, 0.0).astype(jnp.float32)


def _pack_geometry(w: int):
  """Padded per-plane lane width We and planes-per-step P so P*We % 128 == 0."""
  if w >= 128:
    return ((w + 127) // 128) * 128, 1
  we = 1
  while we < w:
    we *= 2                                   # next power of two, <= 128
  return we, 128 // we


def _pack_planes(x, nc_pad: int, we: int):
  """(N, C, H, W) -> (H, nc_pad*we), planes placed side by side along lanes."""
  n, c, h, w = x.shape
  x = x.reshape(n * c, h, w)
  x = jnp.pad(x, ((0, nc_pad - n * c), (0, 0), (0, we - w)))
  return jnp.transpose(x, (1, 0, 2)).reshape(h, nc_pad * we)


@functools.lru_cache(maxsize=1)
def _vmem_limit_bytes() -> int:
  """Generation-aware scoped-VMEM request (~48 MiB v7x, ~96 MiB v5e/v6e)."""
  try:
    cap = int(pltpu.get_tpu_info().vmem_capacity_bytes)
    return max(32 * 1024 * 1024, min((cap * 3) // 4, 112 * 1024 * 1024))
  except Exception:
    return 64 * 1024 * 1024   # conservative fallback


def _const_spec(shape):
  """Revisited constant operand; single-buffered to save VMEM when supported."""
  index_map = lambda i: (0,) * len(shape)
  if hasattr(pl, "Buffered"):
    try:
      return pl.BlockSpec(shape, index_map, pipeline_mode=pl.Buffered(1))
    except Exception:
      pass
  return pl.BlockSpec(shape, index_map)


# ------------------------------ Pallas kernels -------------------------------

def _ssim_tile(a_ref, bd_ref, p_ref, t_ref):
  """SSIM loss for one lane-packed (H, L) tile; returns (H, L) float32."""
  a = a_ref[...]                              # (H, H)  bf16 row-blur matrix
  bd = bd_ref[...]                            # (L, L)  bf16 block-diag col blur
  l = bd.shape[0]
  p16 = p_ref[...]
  t16 = t_ref[...]

  # Products computed directly in bf16 (identical rounding to an f32 multiply
  # followed by a cast; halves VPU work on v6e/v7x).  f32 MXU accumulation.
  cat = jnp.concatenate([p16, t16, p16 * p16, t16 * t16, p16 * t16], axis=1)
  hb = jnp.dot(a, cat, preferred_element_type=jnp.float32)        # row blur
  hb = hb.astype(jnp.bfloat16)
  # TODO(synk): for tighter accuracy keep hb / second-moment columns in f32 for
  #             the column blur (bf16 second moments cancel in low-variance
  #             regions); current tolerances absorb it.
  # TODO(synk): on v5e/v6e the five col blurs could be stacked into one
  #             (5H, L) @ bd matmul (single weight push) if the sublane restack
  #             proves cheaper than five RHS pushes.

  def col_blur(m):
    return jnp.dot(hb[:, m * l:(m + 1) * l], bd,
                   preferred_element_type=jnp.float32)

  # Consume each col-blur result immediately to cut live f32 temporaries.
  mu1 = col_blur(0)
  mu2 = col_blur(1)
  mu1_sq = mu1 * mu1
  mu2_sq = mu2 * mu2
  mu1_mu2 = mu1 * mu2
  sigma1_sq = jnp.maximum(col_blur(2) - mu1_sq, 0.0)   # clamp bf16 round-off
  sigma2_sq = jnp.maximum(col_blur(3) - mu2_sq, 0.0)
  sigma12 = col_blur(4) - mu1_mu2

  num = (2.0 * mu1_mu2 + _C1) * (2.0 * sigma12 + _C2)
  den = (mu1_sq + mu2_sq + _C1) * (sigma1_sq + sigma2_sq + _C2)
  # Divide on the EUP slot; approx-reciprocal error << bf16 operand error.
  return 1.0 - num * pl.reciprocal(den, approx=True)


def _ssim_map_kernel(a_ref, bd_ref, p_ref, t_ref, out_ref):
  out_ref[...] = _ssim_tile(a_ref, bd_ref, p_ref, t_ref)


def _make_sum_kernel(n_mults: int, emit_msum: bool):
  """Fused reduction: accumulate (1, L) partial sums across grid steps.

  Optionally multiplies the loss tile by packed mask/weight tiles and emits a
  second accumulator holding sum(mask) — no full-map HBM writeback/re-read.
  """
  def kernel(*refs):
    a_ref, bd_ref, p_ref, t_ref = refs[:4]
    mult_refs = refs[4:4 + n_mults]
    out_loss_ref = refs[4 + n_mults]
    out_msum_ref = refs[4 + n_mults + 1] if emit_msum else None

    @pl.when(pl.program_id(0) == 0)
    def _():
      out_loss_ref[...] = jnp.zeros_like(out_loss_ref)
      if emit_msum:
        out_msum_ref[...] = jnp.zeros_like(out_msum_ref)

    loss = _ssim_tile(a_ref, bd_ref, p_ref, t_ref)
    for m_ref in mult_refs:
      loss = loss * m_ref[...].astype(jnp.float32)
    out_loss_ref[...] += jnp.sum(loss, axis=0, keepdims=True)
    if emit_msum:
      out_msum_ref[...] += jnp.sum(mult_refs[0][...].astype(jnp.float32),
                                   axis=0, keepdims=True)

  return kernel


# ------------------------------- pallas_call ---------------------------------

def _ssim_pallas(prediction, target, mults=(), fused_sum=False, emit_msum=False):
  n, c, h, w = prediction.shape
  we, p_pack = _pack_geometry(w)
  nc = n * c
  nc_pad = ((nc + p_pack - 1) // p_pack) * p_pack
  g_steps = nc_pad // p_pack
  l = p_pack * we

  g1d = _gaussian_1d(_WINDOW_SIZE, _SIGMA)
  a_mat = _blur_matrix(h, g1d).astype(jnp.bfloat16)              # (H, H)
  b_w = _blur_matrix(w, g1d)                                     # (W, W)
  b_e = jnp.zeros((we, we), jnp.float32).at[:w, :w].set(b_w)     # padded lanes -> 0
  bd = jnp.kron(jnp.eye(p_pack, dtype=jnp.float32), b_e).astype(jnp.bfloat16)

  if p_pack == 1:
    # W >= 128: skip the host-side transpose — planes shipped as (NC, H, We)
    # with a squeezed leading BlockSpec dim (saves a full HBM pass per input).
    def pack(x):
      x = x.astype(jnp.bfloat16).reshape(nc, h, w)
      return jnp.pad(x, ((0, 0), (0, 0), (0, we - w)))
    plane_spec = pl.BlockSpec((None, h, we), lambda i: (i, 0, 0))
    map_out_shape = jax.ShapeDtypeStruct((nc, h, we), jnp.float32)
    map_out_spec = pl.BlockSpec((None, h, we), lambda i: (i, 0, 0))
  else:
    def pack(x):
      return _pack_planes(x.astype(jnp.bfloat16), nc_pad, we)
    plane_spec = pl.BlockSpec((h, l), lambda i: (0, i))
    map_out_shape = jax.ShapeDtypeStruct((h, nc_pad * we), jnp.float32)
    map_out_spec = pl.BlockSpec((h, l), lambda i: (0, i))

  # Zero-padded planes/lanes produce SSIM == 1 -> loss == 0 (and mask == 0),
  # so padding never perturbs the fused sums.
  packed = [pack(prediction), pack(target)] + [pack(m) for m in mults]

  const_a = _const_spec((h, h))
  const_b = _const_spec((l, l))

  flops = g_steps * (2 * h * h * 5 * l + 5 * 2 * h * l * l + 30 * h * l)
  bytes_in = (2 + len(mults)) * h * nc_pad * we * 2 + (h * h + l * l) * 2

  if fused_sum:
    kernel = _make_sum_kernel(len(mults), emit_msum)
    out_shape = [jax.ShapeDtypeStruct((1, l), jnp.float32)]
    out_specs = [pl.BlockSpec((1, l), lambda i: (0, 0))]
    if emit_msum:
      out_shape.append(jax.ShapeDtypeStruct((1, l), jnp.float32))
      out_specs.append(pl.BlockSpec((1, l), lambda i: (0, 0)))
    out_shape, out_specs = tuple(out_shape), tuple(out_specs)
    bytes_out = len(out_shape) * l * 4
    dims = ("arbitrary",)            # output accumulator revisited every step
  else:
    kernel = _ssim_map_kernel
    out_shape, out_specs = map_out_shape, map_out_spec
    bytes_out = h * nc_pad * we * 4
    dims = ("parallel",)

  out = pl.pallas_call(
      kernel,
      out_shape=out_shape,
      grid_spec=pltpu.PrefetchScalarGridSpec(
          num_scalar_prefetch=0,
          grid=(g_steps,),
          in_specs=[const_a, const_b] + [plane_spec] * len(packed),
          out_specs=out_specs,
      ),
      compiler_params=pltpu.CompilerParams(
          dimension_semantics=dims,
          vmem_limit_bytes=_vmem_limit_bytes()),
      cost_estimate=pl.CostEstimate(
          flops=int(flops), transcendentals=0,
          bytes_accessed=int(bytes_in + bytes_out)),
  )(a_mat, bd, *packed)
  return out, (we, p_pack, nc_pad)


@jax.jit
def _ssim_loss_map(prediction, target):
  """Per-pixel SSIM loss map, shape (N, C, H, W), float32."""
  n, c, h, w = prediction.shape
  out, (we, p_pack, nc_pad) = _ssim_pallas(prediction, target, fused_sum=False)
  if p_pack == 1:
    m = out[:, :, :w]                                              # (NC, H, W)
  else:
    m = out.reshape(h, nc_pad, we).transpose(1, 0, 2)[:n * c, :, :w]
  return m.reshape(n, c, h, w)


@functools.partial(jax.jit, static_argnames=("reduction",))
def _ssim_loss_reduced(prediction, target, reduction: str):
  """Fused-reduction path: never materialises the full loss map in HBM."""
  outs, _ = _ssim_pallas(prediction, target, fused_sum=True)
  total = jnp.sum(outs[0])
  if reduction == "mean":
    return total / jnp.float32(prediction.size)
  return total


@jax.jit
def _ssim_masked_sums(prediction, target, mask, weight):
  """Fused masked/weighted reduction: (sum(loss*mask*weight), sum(mask))."""
  mults = tuple(m for m in (mask, weight) if m is not None)
  emit_msum = mask is not None
  outs, _ = _ssim_pallas(prediction, target, mults=mults, fused_sum=True,
                         emit_msum=emit_msum)
  loss_sum = jnp.sum(outs[0])
  if emit_msum:
    denom = jnp.sum(outs[1])
  else:
    # TODO(synk): reference divides by sum(mask) even when mask is None (would
    # raise TypeError); fall back to element count for the weight-only case.
    denom = jnp.float32(prediction.size)
  return loss_sum, denom


# --------------------------- module-equivalent API ---------------------------

class SSIM:
  """JAX/Pallas equivalent of util.losses.SSIM (forward pass)."""

  def __init__(self, name=None, reduction='mean'):
    self.name = 'SSIM' if name is None else name
    self.reduction = reduction

  def _ssim_loss(self, prediction, target, reduction='mean'):
    if reduction in ('mean', 'sum'):
      return _ssim_loss_reduced(prediction, target, reduction=reduction)
    return _ssim_loss_map(prediction, target)

  def __call__(self, prediction, target, mask=None, weight=None):
    if mask is None and weight is None:
      return self._ssim_loss(prediction, target, reduction=self.reduction)
    if self.reduction in ('mean', 'sum'):
      # Fused path: mask / weight multiplied inside the kernel; only (1, L)
      # partial sums ever reach HBM (no full-map writeback + re-read).
      loss_sum, mask_sum = _ssim_masked_sums(prediction, target, mask, weight)
      if self.reduction == 'sum':
        return loss_sum
      return loss_sum / mask_sum
    # reduction == 'none' (or anything else): full map, elementwise mask/weight.
    res = self._ssim_loss(prediction, target, reduction='none')
    if mask is not None:
      res = res * mask
    if weight is not None:
      res = res * weight
    return res


# ------------------------ pure-JAX f32 sanity reference -----------------------

def _ssim_loss_map_ref(prediction, target):
  g = _gaussian_1d(_WINDOW_SIZE, _SIGMA)
  a = _blur_matrix(prediction.shape[2], g)
  b = _blur_matrix(prediction.shape[3], g)

  def blur(x):
    return jnp.einsum('hj,ncjk,kw->nchw', a, x, b)

  p = prediction.astype(jnp.float32)
  t = target.astype(jnp.float32)
  mu1, mu2 = blur(p), blur(t)
  s1 = blur(p * p) - mu1 * mu1
  s2 = blur(t * t) - mu2 * mu2
  s12 = blur(p * t) - mu1 * mu2
  num = (2 * mu1 * mu2 + _C1) * (2 * s12 + _C2)
  den = (mu1 * mu1 + mu2 * mu2 + _C1) * (s1 + s2 + _C2)
  return 1.0 - num / den


# ----------------------------------- main -------------------------------------

if __name__ == "__main__":
  key = jax.random.PRNGKey(0)
  k1, k2, k3, k4, k5, k6 = jax.random.split(key, 6)

  # --- packed path (W < 128): 8 planes share one lane-dense 128-wide tile ----
  N, C, H, W = 2, 4, 16, 16
  prediction = jax.random.uniform(k1, (N, C, H, W), dtype=jnp.float32)
  target = jax.random.uniform(k2, (N, C, H, W), dtype=jnp.float32)
  mask = (jax.random.uniform(k3, (N, C, H, W)) > 0.3).astype(jnp.float32)
  weight = jax.random.uniform(k4, (N, C, H, W), dtype=jnp.float32)

  loss_fn = SSIM(reduction='mean')

  loss = jax.block_until_ready(loss_fn(prediction, target))            # fused
  loss_map = jax.block_until_ready(_ssim_loss_map(prediction, target))  # map
  masked = jax.block_until_ready(loss_fn(prediction, target, mask=mask))
  weighted = jax.block_until_ready(loss_fn(prediction, target, weight=weight))
  mw = jax.block_until_ready(loss_fn(prediction, target, mask=mask, weight=weight))
  sum_loss = jax.block_until_ready(SSIM(reduction='sum')(prediction, target))

  assert loss.shape == () and masked.shape == () and weighted.shape == ()
  assert loss_map.shape == (N, C, H, W)
  for v in (loss, masked, weighted, mw, sum_loss):
    assert bool(jnp.isfinite(v))

  # fused-sum path must agree with the map path
  assert jnp.allclose(loss, jnp.mean(loss_map), rtol=1e-3, atol=1e-4)
  assert jnp.allclose(sum_loss, loss * prediction.size, rtol=1e-3, atol=1e-3)
  # fused masked / weighted paths vs manual reductions of the map
  assert jnp.allclose(masked, jnp.sum(loss_map * mask) / jnp.sum(mask),
                      rtol=1e-2, atol=1e-4)
  assert jnp.allclose(mw, jnp.sum(loss_map * mask * weight) / jnp.sum(mask),
                      rtol=2e-2, atol=1e-3)
  assert jnp.allclose(weighted, jnp.sum(loss_map * weight) / prediction.size,
                      rtol=2e-2, atol=1e-3)
  # pure-JAX f32 reference (bf16 MXU tolerance)
  ref_mean = jnp.mean(_ssim_loss_map_ref(prediction, target))
  assert jnp.allclose(loss, ref_mean, rtol=5e-2, atol=5e-2)

  # --- lane-wide path (W >= 128): squeezed 3-D BlockSpec, no host transpose --
  N2, C2, H2, W2 = 1, 2, 16, 128
  p2 = jax.random.uniform(k5, (N2, C2, H2, W2), dtype=jnp.float32)
  t2 = jax.random.uniform(k6, (N2, C2, H2, W2), dtype=jnp.float32)
  loss2 = jax.block_until_ready(loss_fn(p2, t2))
  map2 = jax.block_until_ready(_ssim_loss_map(p2, t2))
  assert map2.shape == (N2, C2, H2, W2)
  assert jnp.allclose(loss2, jnp.mean(map2), rtol=1e-3, atol=1e-4)
  assert jnp.allclose(loss2, jnp.mean(_ssim_loss_map_ref(p2, t2)),
                      rtol=5e-2, atol=5e-2)

  print("KERNEL_OK")
</pallas_src>

<mosaic_0001>
module attributes {stable_mosaic.version = 11 : i64} {
  func.func @kernel(%arg0: i32, %arg1: memref<16x16xbf16, #tpu.memory_space<vmem>>, %arg2: memref<128x128xbf16, #tpu.memory_space<vmem>>, %arg3: memref<16x128xbf16, #tpu.memory_space<vmem>>, %arg4: memref<16x128xbf16, #tpu.memory_space<vmem>>, %arg5: memref<1x128xf32, #tpu.memory_space<vmem>>) attributes {dimension_semantics = [#tpu.dimension_semantics<arbitrary>], iteration_bounds = array<i64: 1>, scalar_prefetch = 0 : i64, scratch_operands = 0 : i64, tpu.core_type = #tpu.core_type<tc>, window_params = [{pipeline_mode = #tpu.pipeline_mode<synchronous>, transform_indices = @transform_0, window_bounds = array<i64: 16, 16>}, {pipeline_mode = #tpu.pipeline_mode<synchronous>, transform_indices = @transform_1, window_bounds = array<i64: 128, 128>}, {transform_indices = @transform_2, window_bounds = array<i64: 16, 128>}, {transform_indices = @transform_3, window_bounds = array<i64: 16, 128>}, {pipeline_mode = #tpu.pipeline_mode<synchronous>, transform_indices = @transform_4, window_bounds = array<i64: 1, 128>}]} {
    %c0_i32 = arith.constant 0 : i32
    %0 = arith.cmpi eq, %arg0, %c0_i32 : i32
    %1 = arith.extui %0 : i1 to i32
    %c0_i32_0 = arith.constant 0 : i32
    %2 = arith.cmpi ne, %1, %c0_i32_0 : i32
    scf.if %2 {
      %cst_27 = arith.constant 0.000000e+00 : f32
      %58 = vector.broadcast %cst_27 : f32 to vector<1x128xf32>
      %c0_28 = arith.constant 0 : index
      %c0_29 = arith.constant 0 : index
      %59 = vector.load %arg5[%c0_28, %c0_29] : memref<1x128xf32, #tpu.memory_space<vmem>>, vector<1x128xf32>
      tpu.vector_store %arg5[%c0_28, %c0_29], %58 {strides = array<i32>} : memref<1x128xf32, #tpu.memory_space<vmem>>, vector<1x128xf32>,
    } else {
    }
    %c0 = arith.constant 0 : index
    %c0_1 = arith.constant 0 : index
    %3 = vector.load %arg1[%c0, %c0_1] : memref<16x16xbf16, #tpu.memory_space<vmem>>, vector<16x16xbf16>
    %c0_2 = arith.constant 0 : index
    %c0_3 = arith.constant 0 : index
    %4 = vector.load %arg2[%c0_2, %c0_3] : memref<128x128xbf16, #tpu.memory_space<vmem>>, vector<128x128xbf16>
    %c0_4 = arith.constant 0 : index
    %c0_5 = arith.constant 0 : index
    %5 = vector.load %arg3[%c0_4, %c0_5] : memref<16x128xbf16, #tpu.memory_space<vmem>>, vector<16x128xbf16>
    %c0_6 = arith.constant 0 : index
    %c0_7 = arith.constant 0 : index
    %6 = vector.load %arg4[%c0_6, %c0_7] : memref<16x128xbf16, #tpu.memory_space<vmem>>, vector<16x128xbf16>
    %7 = arith.mulf %5, %5 : vector<16x128xbf16>
    %8 = arith.mulf %6, %6 : vector<16x128xbf16>
    %9 = arith.mulf %5, %6 : vector<16x128xbf16>
    %10 = tpu.concatenate %5, %6, %7, %8, %9 in 1 : vector<16x128xbf16>, vector<16x128xbf16>, vector<16x128xbf16>, vector<16x128xbf16>, vector<16x128xbf16> -> vector<16x640xbf16>
    %cst = arith.constant dense<0.000000e+00> : vector<16x640xf32>
    %11 = tpu.matmul %3, %10, %cst {dimension_numbers = #tpu.dot_dimension_numbers<[1], [0], [0], [1], [0, 0, 1, 1], [], []>} : vector<16x16xbf16>, vector<16x640xbf16>, vector<16x640xf32> -> vector<16x640xf32>
    %12 = arith.truncf %11 : vector<16x640xf32> to vector<16x640xbf16>
    %13 = vector.extract_strided_slice %12 {offsets = [0, 0], sizes = [16, 128], strides = [1, 1]} : vector<16x640xbf16> to vector<16x128xbf16>
    %cst_8 = arith.constant dense<0.000000e+00> : vector<16x128xf32>
    %14 = tpu.matmul %13, %4, %cst_8 {dimension_numbers = #tpu.dot_dimension_numbers<[1], [0], [0], [1], [0, 0, 1, 1], [], []>} : vector<16x128xbf16>, vector<128x128xbf16>, vector<16x128xf32> -> vector<16x128xf32>
    %15 = vector.extract_strided_slice %12 {offsets = [0, 128], sizes = [16, 128], strides = [1, 1]} : vector<16x640xbf16> to vector<16x128xbf16>
    %cst_9 = arith.constant dense<0.000000e+00> : vector<16x128xf32>
    %16 = tpu.matmul %15, %4, %cst_9 {dimension_numbers = #tpu.dot_dimension_numbers<[1], [0], [0], [1], [0, 0, 1, 1], [], []>} : vector<16x128xbf16>, vector<128x128xbf16>, vector<16x128xf32> -> vector<16x128xf32>
    %17 = arith.mulf %14, %14 : vector<16x128xf32>
    %18 = arith.mulf %16, %16 : vector<16x128xf32>
    %19 = arith.mulf %14, %16 : vector<16x128xf32>
    %20 = vector.extract_strided_slice %12 {offsets = [0, 256], sizes = [16, 128], strides = [1, 1]} : vector<16x640xbf16> to vector<16x128xbf16>
    %cst_10 = arith.constant dense<0.000000e+00> : vector<16x128xf32>
    %21 = tpu.matmul %20, %4, %cst_10 {dimension_numbers = #tpu.dot_dimension_numbers<[1], [0], [0], [1], [0, 0, 1, 1], [], []>} : vector<16x128xbf16>, vector<128x128xbf16>, vector<16x128xf32> -> vector<16x128xf32>
    %22 = arith.subf %21, %17 : vector<16x128xf32>
    %cst_11 = arith.constant 0.000000e+00 : f32
    %23 = vector.broadcast %cst_11 : f32 to vector<16x128xf32>
    %24 = arith.maximumf %22, %23 : vector<16x128xf32>
    %25 = vector.extract_strided_slice %12 {offsets = [0, 384], sizes = [16, 128], strides = [1, 1]} : vector<16x640xbf16> to vector<16x128xbf16>
    %cst_12 = arith.constant dense<0.000000e+00> : vector<16x128xf32>
    %26 = tpu.matmul %25, %4, %cst_12 {dimension_numbers = #tpu.dot_dimension_numbers<[1], [0], [0], [1], [0, 0, 1, 1], [], []>} : vector<16x128xbf16>, vector<128x128xbf16>, vector<16x128xf32> -> vector<16x128xf32>
    %27 = arith.subf %26, %18 : vector<16x128xf32>
    %cst_13 = arith.constant 0.000000e+00 : f32
    %28 = vector.broadcast %cst_13 : f32 to vector<16x128xf32>
    %29 = arith.maximumf %27, %28 : vector<16x128xf32>
    %30 = vector.extract_strided_slice %12 {offsets = [0, 512], sizes = [16, 128], strides = [1, 1]} : vector<16x640xbf16> to vector<16x128xbf16>
    %cst_14 = arith.constant dense<0.000000e+00> : vector<16x128xf32>
    %31 = tpu.matmul %30, %4, %cst_14 {dimension_numbers = #tpu.dot_dimension_numbers<[1], [0], [0], [1], [0, 0, 1, 1], [], []>} : vector<16x128xbf16>, vector<128x128xbf16>, vector<16x128xf32> -> vector<16x128xf32>
    %32 = arith.subf %31, %19 : vector<16x128xf32>
    %cst_15 = arith.constant 2.000000e+00 : f32
    %33 = vector.broadcast %cst_15 : f32 to vector<16x128xf32>
    %34 = arith.mulf %33, %19 : vector<16x128xf32>
    %cst_16 = arith.constant 9.99999974E-5 : f32
    %35 = vector.broadcast %cst_16 : f32 to vector<16x128xf32>
    %36 = arith.addf %34, %35 : vector<16x128xf32>
    %cst_17 = arith.constant 2.000000e+00 : f32
    %37 = vector.broadcast %cst_17 : f32 to vector<16x128xf32>
    %38 = arith.mulf %37, %32 : vector<16x128xf32>
    %cst_18 = arith.constant 8.99999984E-4 : f32
    %39 = vector.broadcast %cst_18 : f32 to vector<16x128xf32>
    %40 = arith.addf %38, %39 : vector<16x128xf32>
    %41 = arith.mulf %36, %40 : vector<16x128xf32>
    %42 = arith.addf %17, %18 : vector<16x128xf32>
    %cst_19 = arith.constant 9.99999974E-5 : f32
    %43 = vector.broadcast %cst_19 : f32 to vector<16x128xf32>
    %44 = arith.addf %42, %43 : vector<16x128xf32>
    %45 = arith.addf %24, %29 : vector<16x128xf32>
    %cst_20 = arith.constant 8.99999984E-4 : f32
    %46 = vector.broadcast %cst_20 : f32 to vector<16x128xf32>
    %47 = arith.addf %45, %46 : vector<16x128xf32>
    %48 = arith.mulf %44, %47 : vector<16x128xf32>
    %49 = tpu.reciprocal %48 {approx = true} : vector<16x128xf32> -> vector<16x128xf32>
    %50 = arith.mulf %41, %49 : vector<16x128xf32>
    %cst_21 = arith.constant 1.000000e+00 : f32
    %51 = vector.broadcast %cst_21 : f32 to vector<16x128xf32>
    %52 = arith.subf %51, %50 : vector<16x128xf32>
    %c0_22 = arith.constant 0 : index
    %c0_23 = arith.constant 0 : index
    %53 = vector.load %arg5[%c0_22, %c0_23] : memref<1x128xf32, #tpu.memory_space<vmem>>, vector<1x128xf32>
    %cst_24 = arith.constant dense<0.000000e+00> : vector<128xf32>
    %54 = vector.multi_reduction <add>, %52, %cst_24 [0] : vector<16x128xf32> to vector<128xf32>
    %55 = vector.shape_cast %54 : vector<128xf32> to vector<1x128xf32>
    %56 = arith.addf %53, %55 : vector<1x128xf32>
    %c0_25 = arith.constant 0 : index
    %c0_26 = arith.constant 0 : index
    %57 = vector.load %arg5[%c0_25, %c0_26] : memref<1x128xf32, #tpu.memory_space<vmem>>, vector<1x128xf32>
    tpu.vector_store %arg5[%c0_25, %c0_26], %56 {strides = array<i32>} : memref<1x128xf32, #tpu.memory_space<vmem>>, vector<1x128xf32>,
    return
  }
  func.func @transform_0(%arg0: i32) -> (i32, i32) {
    %c0_i32 = arith.constant 0 : i32
    %c0_i32_0 = arith.constant 0 : i32
    %c0_i32_1 = arith.constant 0 : i32
    return %c0_i32, %c0_i32_0 : i32, i32
  }
  func.func @transform_1(%arg0: i32) -> (i32, i32) {
    %c0_i32 = arith.constant 0 : i32
    %c0_i32_0 = arith.constant 0 : i32
    %c0_i32_1 = arith.constant 0 : i32
    return %c0_i32, %c0_i32_0 : i32, i32
  }
  func.func @transform_2(%arg0: i32) -> (i32, i32) {
    %c0_i32 = arith.constant 0 : i32
    %c0_i32_0 = arith.constant 0 : i32
    return %c0_i32, %arg0 : i32, i32
  }
  func.func @transform_3(%arg0: i32) -> (i32, i32) {
    %c0_i32 = arith.constant 0 : i32
    %c0_i32_0 = arith.constant 0 : i32
    return %c0_i32, %arg0 : i32, i32
  }
  func.func @transform_4(%arg0: i32) -> (i32, i32) {
    %c0_i32 = arith.constant 0 : i32
    %c0_i32_0 = arith.constant 0 : i32
    %c0_i32_1 = arith.constant 0 : i32
    return %c0_i32, %c0_i32_0 : i32, i32
  }
}

</mosaic_0001>

<bundles_post_ra>
// kernel: _ssim_loss_reduced.1
= control target key start
LH: loop header
LB: loop body
LE: loop exit
PB: predicated region body
PF: predicated region fallthrough
CT: control target
= control target key end

     0   :  { %v719_v3 = vmov 0   ;;  %v720_v4 = vmov 0.0   ;;  %vm721_vm0 = vmmov 0   ;;  %vm86_vm1 = vcmask 130048   ;;  %s908_s3 = inlined_call_operand.vmem [shape: bf16[16,128], index: 3, kind: input, shape index: {}]   ;;  %s909_s2 = inlined_call_operand.vmem [shape: bf16[16,128], index: 2, kind: input, shape index: {}]   ;;  %s910_s0 = inlined_call_operand.vmem [shape: bf16[16,16], index: 0, kind: input, shape index: {}]   ;;  %s911_s1 = inlined_call_operand.vmem [shape: bf16[128,128], index: 1, kind: input, shape index: {}]   ;;  %s912_s4 = inlined_call_operand.vmem [shape: f32[1,128], index: 4, kind: output, shape index: {}]  }
   0x1   :  { %v43_v0 = vld [vmem:[%s908_s3] sm:$0xf]  ;;  %v44_v1 = vld [vmem:[%s908_s3 + $0x4] sm:$0xf]  ;;  %122 = vmatprep.mubr.bf16.mxu0 %v719_v3  ;;  %601 = vmatprep.subr.bf16.mxu1 %v720_v4  ;;  %v768_v14 = vld [vmem:[%s911_s1 + $0x38] sm:$0xff]   ;;  %22 = vst [vmem:[%s912_s4] sm:$0x1] %v720_v4 }
   0x2   :  { %v41_v2 = vld [vmem:[%s909_s2] sm:$0xf]  ;;  %v47_v5 = vmul.bf16 %v43_v0, %v43_v0  ;;  %v48_v6 = vmul.bf16 %v44_v1, %v44_v1  ;;  %v532_v7 = vcombine.low %v43_v0, %v44_v1  ;;  %v42_v8 = vld [vmem:[%s909_s2 + $0x4] sm:$0xf]  ;;  %617 = vmatprep.mubr.msk.bf16.mxu1 %vm721_vm0, %v720_v4  ;;  %602 = vmatpush3.bf16.msra.mxu1 %v768_v14  ;;  %v774_v16 = vld [vmem:[%s911_s1 + $0x30] sm:$0xff]  }
   0x3   :  { %v45_v9 = vmul.bf16 %v41_v2, %v41_v2  ;;  %v46_v10 = vmul.bf16 %v42_v8, %v42_v8  ;;  %v531_v11 = vcombine.low %v41_v2, %v42_v8  ;;  %v706_v12 = vld [vmem:[%s910_s0] sm:$0xff]   ;;  %603 = vmatprep.subr.bf16.mxu1 %v720_v4  ;;  %v49_v17 = vmul.bf16 %v43_v0, %v41_v2  ;;  %v783_v19 = vld [vmem:[%s911_s1 + $0x28] sm:$0xff]   ;;  %v801_v22 = vld [vmem:[%s911_s1 + $0x18] sm:$0xff]  }
   0x4   :  { %104 = vmatprep.subr.bf16.mxu0 %v532_v7  ;;  %v534_v13 = vcombine.low %v47_v5, %v48_v6  ;;  %v50_v18 = vmul.bf16 %v44_v1, %v42_v8  ;;  %v790_v21 = vld [vmem:[%s911_s1 + $0x20] sm:$0xff]   ;;  %v808_v23 = vld [vmem:[%s911_s1 + $0x10] sm:$0xff]   ;;  %v820_v24 = vld [vmem:[%s911_s1 + $0x8] sm:$0xff]  }
   0x5   :  { %105 = vmatpush1.bf16.msra.mxu0 %v531_v11  ;;  %v533_v15 = vcombine.low %v45_v9, %v46_v10  ;;  %v840_v25 = vld [vmem:[%s911_s1] sm:$0xff]  }
   0x6   :  { %147 = vmatprep.subr.bf16.mxu0 %v534_v13  ;;  %604 = vmatpush3.bf16.msra.mxu1 %v774_v16  ;;  %v535_v20 = vcombine.low %v49_v17, %v50_v18 }
   0x7   :  { %605 = vmatprep.subr.bf16.mxu1 %v720_v4 }
   0x8   :  { %537 = vmatmul.mubr.msk.bf16.vlgmr.msra.gmra.mxu0 %vm86_vm1, %v706_v12 }
   0x9   :  { %148 = vmatpush1.bf16.msra.mxu0 %v533_v15  ;;  %165 = vmatprep.mubr.bf16.mxu0 %v719_v3 }
   0xa   :  { %595 = vmatprep.subr.bf16.mxu0 %v720_v4  ;;  %606 = vmatpush3.bf16.msra.mxu1 %v783_v19 }
   0xb   :  { %607 = vmatprep.subr.bf16.mxu1 %v720_v4 }
   0xe   :  { %608 = vmatpush3.bf16.msra.mxu1 %v790_v21 }
   0xf   :  { %609 = vmatprep.subr.bf16.mxu1 %v720_v4 }
  0x10   :  { %538 = vmatmul.mubr.msk.bf16.vlgmr.msra.gmra.mxu0 %vm86_vm1, %v706_v12 }
  0x11   :  { %596 = vmatpush3.bf16.msra.mxu0 %v535_v20  ;;  %597 = vmatprep.mubr.msk.bf16.mxu0 %vm721_vm0, %v720_v4 }
  0x12   :  { %621 = vmatprep.subr.bf16.mxu0 %v720_v4  ;;  %610 = vmatpush3.bf16.msra.mxu1 %v801_v22 }
  0x13   :  { %611 = vmatprep.subr.bf16.mxu1 %v720_v4 }
  0x16   :  { %612 = vmatpush3.bf16.msra.mxu1 %v808_v23 }
  0x17   :  { %613 = vmatprep.subr.bf16.mxu1 %v720_v4 }
  0x18   :  { %598 = vmatmul.mubr.msk.bf16.vlgmr.msra.gmra.mxu0 %vm86_vm1, %v706_v12 }
  0x19   :  { %622 = vmatpush3.bf16.msra.mxu0 %v768_v14  ;;  %637 = vmatprep.mubr.msk.bf16.mxu0 %vm721_vm0, %v720_v4 }
  0x1a   :  { %623 = vmatprep.subr.bf16.mxu0 %v720_v4  ;;  %614 = vmatpush3.bf16.msra.mxu1 %v820_v24 }
  0x1b   :  { %615 = vmatprep.subr.bf16.mxu1 %v720_v4 }
  0x1d   :  { %624 = vmatpush3.bf16.msra.mxu0 %v774_v16 }
  0x1e   :  { %625 = vmatprep.subr.bf16.mxu0 %v720_v4  ;;  %616 = vmatpush3.bf16.msra.mxu1 %v840_v25 }
  0x1f   :  { %641 = vmatprep.subr.bf16.mxu1 %v720_v4 }
  0x21   :  { %626 = vmatpush3.bf16.msra.mxu0 %v783_v19 }
  0x22   :  { %627 = vmatprep.subr.bf16.mxu0 %v720_v4 }
  0x25   :  { %628 = vmatpush3.bf16.msra.mxu0 %v790_v21 }
  0x26   :  { %629 = vmatprep.subr.bf16.mxu0 %v720_v4 }
  0x29   :  { %630 = vmatpush3.bf16.msra.mxu0 %v801_v22 }
  0x2a   :  { %631 = vmatprep.subr.bf16.mxu0 %v720_v4 }
  0x2d   :  { %632 = vmatpush3.bf16.msra.mxu0 %v808_v23 }
  0x2e   :  { %633 = vmatprep.subr.bf16.mxu0 %v720_v4 }
  0x31   :  { %634 = vmatpush3.bf16.msra.mxu0 %v820_v24 }
  0x32   :  { %635 = vmatprep.subr.bf16.mxu0 %v720_v4 }
  0x35   :  { %636 = vmatpush3.bf16.msra.mxu0 %v840_v25 }
  0x36   :  { %661 = vmatprep.subr.bf16.mxu0 %v720_v4 }
  0xc8   :  { %v124_v26 = vpop.f32.mrf.mxu0 }
  0xca   :  { %v126_v27 = vpop.f32.mrf.mxu0 }
  0xcc   :  { %v128_v28 = vpop.f32.mrf.mxu0 }
  0xcd   :  { %v217_v29 = vpack.c.bf16 %v128_v28, %v124_v26 }
  0xce   :  { %v130_v30 = vpop.f32.mrf.mxu0 }
  0xcf   :  { %v218_v31 = vpack.c.bf16 %v130_v30, %v126_v27  ;;  %618 = vmatmul.mubr.bf16.vlgmr.msra.gmra.mxu1 %v217_v29 }
  0xd0   :  { %642 = vmatpush3.bf16.msra.mxu1 %v768_v14  ;;  %v167_v32 = vpop.f32.mrf.mxu0  ;;  %657 = vmatprep.mubr.msk.bf16.mxu1 %vm721_vm0, %v720_v4 }
  0xd1   :  { %638 = vmatmul.mubr.bf16.vlgmr.msra.gmra.mxu0 %v218_v31  ;;  %643 = vmatprep.subr.bf16.mxu1 %v720_v4 }
  0xd2   :  { %662 = vmatpush3.bf16.msra.mxu0 %v768_v14  ;;  %v169_v33 = vpop.f32.mrf.mxu0  ;;  %677 = vmatprep.mubr.msk.bf16.mxu0 %vm721_vm0, %v720_v4 }
  0xd3   :  { %663 = vmatprep.subr.bf16.mxu0 %v720_v4 }
  0xd4   :  { %644 = vmatpush3.bf16.msra.mxu1 %v774_v16  ;;  %v171_v34 = vpop.f32.mrf.mxu0 }
  0xd5   :  { %645 = vmatprep.subr.bf16.mxu1 %v720_v4  ;;  %v219_v40 = vpack.c.bf16 %v171_v34, %v167_v32 }
  0xd6   :  { %664 = vmatpush3.bf16.msra.mxu0 %v774_v16  ;;  %v173_v35 = vpop.f32.mrf.mxu0 }
  0xd7   :  { %665 = vmatprep.subr.bf16.mxu0 %v720_v4  ;;  %v220_v41 = vpack.c.bf16 %v173_v35, %v169_v33 }
  0xd8   :  { %646 = vmatpush3.bf16.msra.mxu1 %v783_v19  ;;  %v210_v36 = vpop.f32.mrf.mxu0 }
  0xd9   :  { %647 = vmatprep.subr.bf16.mxu1 %v720_v4 }
  0xda   :  { %666 = vmatpush3.bf16.msra.mxu0 %v783_v19  ;;  %v599_v37 = vpop.f32.mrf.mxu0 }
  0xdb   :  { %667 = vmatprep.subr.bf16.mxu0 %v720_v4 }
  0xdc   :  { %648 = vmatpush3.bf16.msra.mxu1 %v790_v21  ;;  %v213_v38 = vpop.f32.mrf.mxu0 }
  0xdd   :  { %649 = vmatprep.subr.bf16.mxu1 %v720_v4  ;;  %v221_v42 = vpack.c.bf16 %v213_v38, %v210_v36 }
  0xde   :  { %668 = vmatpush3.bf16.msra.mxu0 %v790_v21  ;;  %v600_v39 = vpop.f32.mrf.mxu0 }
  0xdf   :  { %669 = vmatprep.subr.bf16.mxu0 %v720_v4 }
  0xe0   :  { %650 = vmatpush3.bf16.msra.mxu1 %v801_v22 }
  0xe1   :  { %651 = vmatprep.subr.bf16.mxu1 %v720_v4 }
  0xe2   :  { %670 = vmatpush3.bf16.msra.mxu0 %v801_v22 }
  0xe3   :  { %671 = vmatprep.subr.bf16.mxu0 %v720_v4 }
  0xe4   :  { %652 = vmatpush3.bf16.msra.mxu1 %v808_v23 }
  0xe5   :  { %653 = vmatprep.subr.bf16.mxu1 %v720_v4 }
  0xe6   :  { %672 = vmatpush3.bf16.msra.mxu0 %v808_v23 }
  0xe7   :  { %673 = vmatprep.subr.bf16.mxu0 %v720_v4 }
  0xe8   :  { %654 = vmatpush3.bf16.msra.mxu1 %v820_v24 }
  0xe9   :  { %655 = vmatprep.subr.bf16.mxu1 %v720_v4 }
  0xea   :  { %674 = vmatpush3.bf16.msra.mxu0 %v820_v24 }
  0xeb   :  { %675 = vmatprep.subr.bf16.mxu0 %v720_v4 }
  0xec   :  { %656 = vmatpush3.bf16.msra.mxu1 %v840_v25 }
  0xed   :  { %681 = vmatprep.subr.bf16.mxu1 %v720_v4 }
  0xee   :  { %676 = vmatpush3.bf16.msra.mxu0 %v840_v25 }
  0xef   :  { %658 = vmatmul.mubr.bf16.vlgmr.msra.gmra.mxu1 %v219_v40 }
  0xf0   :  { %682 = vmatpush3.bf16.msra.mxu1 %v768_v14  ;;  %697 = vmatprep.mubr.msk.bf16.mxu1 %vm721_vm0, %v720_v4 }
  0xf1   :  { %678 = vmatmul.mubr.bf16.vlgmr.msra.gmra.mxu0 %v220_v41  ;;  %683 = vmatprep.subr.bf16.mxu1 %v720_v4 }
  0xf4   :  { %684 = vmatpush3.bf16.msra.mxu1 %v774_v16 }
  0xf5   :  { %685 = vmatprep.subr.bf16.mxu1 %v720_v4 }
  0xf8   :  { %686 = vmatpush3.bf16.msra.mxu1 %v783_v19 }
  0xf9   :  { %687 = vmatprep.subr.bf16.mxu1 %v720_v4 }
  0xfc   :  { %688 = vmatpush3.bf16.msra.mxu1 %v790_v21 }
  0xfd   :  { %689 = vmatprep.subr.bf16.mxu1 %v720_v4 }
 0x100   :  { %690 = vmatpush3.bf16.msra.mxu1 %v801_v22 }
 0x101   :  { %691 = vmatprep.subr.bf16.mxu1 %v720_v4 }
 0x104   :  { %692 = vmatpush3.bf16.msra.mxu1 %v808_v23 }
 0x105   :  { %693 = vmatprep.subr.bf16.mxu1 %v720_v4 }
 0x108   :  { %694 = vmatpush3.bf16.msra.mxu1 %v820_v24 }
 0x109   :  { %695 = vmatprep.subr.bf16.mxu1 %v720_v4 }
 0x10c   :  { %696 = vmatpush3.bf16.msra.mxu1 %v840_v25 }
 0x10f   :  { %698 = vmatmul.mubr.bf16.vlgmr.msra.gmra.mxu1 %v221_v42 }
 0x18f   :  { %v304_v43 = vpop.f32.mrf.mxu1 }
 0x190   :  { %v352_v61 = vmul.f32 %v304_v43, %v304_v43 }
 0x191   :  { %v619_v44 = vpop.f32.mrf.mxu1  ;;  %v345_v45 = vpop.f32.mrf.mxu0 }
 0x192   :  { %v356_v46 = vmul.f32 %v345_v45, %v304_v43  ;;  %v354_v59 = vmul.f32 %v345_v45, %v345_v45 }
 0x193   :  { %v307_v47 = vpop.f32.mrf.mxu1  ;;  %v639_v48 = vpop.f32.mrf.mxu0 }
 0x194   :  { %v353_v0 = vmul.f32 %v307_v47, %v307_v47  ;;  %v501_v9 = vadd.f32 %v354_v59, %v352_v61  ;;  %v491_v19 = vmul.f32 2.0, %v356_v46 }
 0x195   :  { %v620_v49 = vpop.f32.mrf.mxu1  ;;  %v348_v50 = vpop.f32.mrf.mxu0 }
 0x196   :  { %v355_v62 = vmul.f32 %v348_v50, %v348_v50  ;;  %v503_v13 = vadd.f32 0.0001, %v501_v9  ;;  %v357_v20 = vmul.f32 %v348_v50, %v307_v47  ;;  %v493_v25 = vadd.f32 0.0001, %v491_v19  ;;  %v517_v47 = vld [vmem:[%s912_s4] sm:$0x1] }
 0x197   :  { %v640_v51 = vpop.f32.mrf.mxu0 }
 0x198   :  { %v502_v11 = vadd.f32 %v355_v62, %v353_v0  ;;  %v492_v26 = vmul.f32 2.0, %v357_v20 }
 0x19a   :  { %v504_v15 = vadd.f32 0.0001, %v502_v11  ;;  %v494_v32 = vadd.f32 0.0001, %v492_v26 }
 0x1af   :  { %v392_v52 = vpop.f32.mrf.mxu1 }
 0x1b0   :  { %v399_v1 = vsub.f32 %v392_v52, %v352_v61 }
 0x1b1   :  { %v659_v53 = vpop.f32.mrf.mxu1  ;;  %v437_v54 = vpop.f32.mrf.mxu0 }
 0x1b2   :  { %v444_v63 = vsub.f32 %v437_v54, %v354_v59  ;;  %v401_v5 = vmax.f32 %v399_v1, 0.0 }
 0x1b3   :  { %v395_v55 = vpop.f32.mrf.mxu1  ;;  %v679_v56 = vpop.f32.mrf.mxu0 }
 0x1b4   :  { %v446_v3 = vmax.f32 %v444_v63, 0.0  ;;  %v400_v4 = vsub.f32 %v395_v55, %v353_v0 }
 0x1b5   :  { %v660_v57 = vpop.f32.mrf.mxu1  ;;  %v440_v58 = vpop.f32.mrf.mxu0 }
 0x1b6   :  { %v445_v2 = vsub.f32 %v440_v58, %v355_v62  ;;  %v505_v7 = vadd.f32 %v446_v3, %v401_v5  ;;  %v402_v8 = vmax.f32 %v400_v4, 0.0 }
 0x1b7   :  { %v680_v60 = vpop.f32.mrf.mxu0 }
 0x1b8   :  { %v447_v6 = vmax.f32 %v445_v2, 0.0  ;;  %v507_v12 = vadd.f32 0.0009, %v505_v7 }
 0x1ba   :  { %v506_v10 = vadd.f32 %v447_v6, %v402_v8  ;;  %v509_v16 = vmul.f32 %v507_v12, %v503_v13 }
 0x1bc   :  { %v508_v14 = vadd.f32 0.0009, %v506_v10  ;;  %715 = vrcp.f32 %v509_v16 }
 0x1be   :  { %v510_v17 = vmul.f32 %v508_v14, %v504_v15 }
 0x1c0   :  { %717 = vrcp.f32 %v510_v17 }
 0x1c9   :  { %v716_v34 = vpop.eup %715 }
 0x1cd   :  { %v718_v37 = vpop.eup %717 }
 0x1cf   :  { %v482_v18 = vpop.f32.mrf.mxu1 }
 0x1d0   :  { %v489_v21 = vsub.f32 %v482_v18, %v356_v46 }
 0x1d1   :  { %v699_v22 = vpop.f32.mrf.mxu1 }
 0x1d2   :  { %v495_v23 = vmul.f32 2.0, %v489_v21 }
 0x1d3   :  { %v485_v24 = vpop.f32.mrf.mxu1 }
 0x1d4   :  { %v497_v27 = vadd.f32 0.0009, %v495_v23  ;;  %v490_v28 = vsub.f32 %v485_v24, %v357_v20 }
 0x1d5   :  { %v700_v29 = vpop.f32.mrf.mxu1 }
 0x1d6   :  { %v499_v30 = vmul.f32 %v497_v27, %v493_v25  ;;  %v496_v31 = vmul.f32 2.0, %v490_v28 }
 0x1d8   :  { %v498_v33 = vadd.f32 0.0009, %v496_v31  ;;  %v513_v35 = vmul.f32 %v716_v34, %v499_v30 }
 0x1da   :  { %v500_v36 = vmul.f32 %v498_v33, %v494_v32  ;;  %v515_v39 = vsub.f32 1.0, %v513_v35 }
 0x1dc   :  { %v514_v38 = vmul.f32 %v718_v37, %v500_v36 }
 0x1de   :  { %v516_v40 = vsub.f32 1.0, %v514_v38 }
 0x1e0   :  { %v518_v41 = vadd.f32 %v516_v40, %v515_v39 }
 0x1e2   :  { %v519_v42 = vrot.slane %v518_v41, 4 }
 0x1e4   :  { %v520_v43 = vadd.f32 %v519_v42, %v518_v41 }
 0x1e6   :  { %v521_v44 = vrot.slane %v520_v43, 2 }
 0x1e8   :  { %v522_v45 = vadd.f32 %v521_v44, %v520_v43 }
 0x1ea   :  { %v523_v46 = vrot.slane %v522_v45, 1 }
 0x1ec   :  { %v524_v48 = vadd.f32 %v523_v46, %v522_v45 }
 0x1ee   :  { %v525_v49 = vadd.f32 %v524_v48, %v517_v47 }
 0x1f0   :  { %526 = vst [vmem:[%s912_s4] sm:$0x1] %v525_v49 }

</bundles_post_ra>
